<compile_context>
chip_gen: v6e
topology: v6e:2x2x1
jax: 0.10.0
libtpu: 0.0.40
codegen_flags: <defaults>
</compile_context>

<pallas_src>
import jax
import jax.numpy as jnp
from jax.experimental import pallas as pl
from jax.experimental.pallas import tpu as pltpu

BN_EPS = 1e-5


# ---------------------------------------------------------------------------
# Fused kernel (all layers back-to-back, intermediates never leave VMEM)
# ---------------------------------------------------------------------------
def _make_fused_kernel(layer_meta, n_batch, compute_dtype):
    """Build the fused kernel.

    layer_meta: tuple of {"ksize", "c_in", "c_out", "has_bn"} in layer order.
    Kernel ref order: x_ref (N, C0, L), then per-layer params
      (w[, gamma, beta] for conv+BN+ReLU layers; w, bias for the final conv),
      then o_ref (N, C_last, L_out).
    """

    def kernel(*refs):
        x_ref, o_ref = refs[0], refs[-1]
        param_refs = refs[1:-1]

        # Channels-first (C, L) per sample, straight from the NCL input: no transpose at
        # all, single cast to the MXU compute dtype.
        xs = [x_ref[n].astype(compute_dtype) for n in range(n_batch)]   # each (C0, L)

        pi = 0
        for meta in layer_meta:
            K = meta["ksize"]
            w_ref = param_refs[pi]; pi += 1                      # (K, C_out, C_in)
            ws = [w_ref[k] for k in range(K)]                    # K x (C_out, C_in)
            L_out = xs[0].shape[1] - K + 1

            # Conv1d (valid, stride 1): K shifted 2-D matmuls, f32 accumulation on the MXU.
            # (C_out, C_in) @ (C_in, L_out) -> (C_out, L_out): channels on sublanes,
            # length on lanes — same orientation as the final NCL output.
            accs = []
            for xn in xs:
                acc = jnp.dot(ws[0], xn[:, 0:L_out],
                              preferred_element_type=jnp.float32)
                for k in range(1, K):
                    acc = acc + jnp.dot(ws[k], xn[:, k:k + L_out],
                                        preferred_element_type=jnp.float32)
                accs.append(acc)                                 # (C_out, L_out) f32

            if meta["has_bn"]:
                gamma = param_refs[pi][...].astype(jnp.float32); pi += 1   # (C_out, 1)
                beta = param_refs[pi][...].astype(jnp.float32); pi += 1    # (C_out, 1)
                inv_m = 1.0 / (n_batch * L_out)
                # Two-pass batch statistics over the whole (N, L_out) batch, in f32.
                mean = sum(jnp.sum(a, axis=1, keepdims=True) for a in accs) * inv_m
                centered = [a - mean for a in accs]
                var = sum(jnp.sum(c * c, axis=1, keepdims=True) for c in centered) * inv_m
                # Fold the BN affine into the normalization.
                scale = gamma * jax.lax.rsqrt(var + BN_EPS)                # (C_out, 1)
                xs = [jnp.maximum(c * scale + beta, 0.0).astype(compute_dtype)
                      for c in centered]
            else:
                bias = param_refs[pi][...].astype(jnp.float32); pi += 1    # (C_out, 1)
                xs = [a + bias for a in accs]                              # stays f32

        # Store directly in NCL — already (C_out, L_out) per sample, no relayout needed.
        for n in range(n_batch):
            o_ref[n] = xs[n].astype(o_ref.dtype)

    return kernel


# ---------------------------------------------------------------------------
# One-time parameter preprocessing (hoisted out of the forward pass)
# ---------------------------------------------------------------------------
def preprocess_params(params, compute_dtype=jnp.float32):
    """Convert PyTorch-layout params into kernel-ready form.

    - Conv weights (C_out, C_in, K) -> (K, C_out, C_in) so each tap w[k] is a 2-D matmul
      operand, cast to the MXU compute dtype.
    - gamma/beta/bias kept in f32 with shape (C_out, 1) (BN/bias arithmetic runs in f32 and
      broadcasts along the lane/length axis).
    """
    n_layers = len(params)
    flat, layer_meta = [], []
    for i, p in enumerate(params):
        w = jnp.transpose(p["weight"], (2, 0, 1))        # (C_out,C_in,K) -> (K,C_out,C_in)
        K, c_out, c_in = w.shape
        flat.append(w.astype(compute_dtype))
        if i == n_layers - 1:
            flat.append(p["bias"].astype(jnp.float32).reshape(c_out, 1))
            layer_meta.append({"ksize": int(K), "c_in": int(c_in), "c_out": int(c_out),
                               "has_bn": False})
        else:
            flat.append(p["gamma"].astype(jnp.float32).reshape(c_out, 1))
            flat.append(p["beta"].astype(jnp.float32).reshape(c_out, 1))
            layer_meta.append({"ksize": int(K), "c_in": int(c_in), "c_out": int(c_out),
                               "has_bn": True})
    return {
        "flat": tuple(flat),
        "layer_meta": tuple(layer_meta),
        "compute_dtype": compute_dtype,
        "c_out": int(layer_meta[-1]["c_out"]),
    }


# ---------------------------------------------------------------------------
# Wrapper
# ---------------------------------------------------------------------------
def _vmem_limit_bytes(x_ncl, flat, layer_meta, compute_dtype):
    """Explicit (rough) VMEM footprint estimate -> scoped-VMEM limit for the compiler."""
    cbytes = jnp.dtype(compute_dtype).itemsize
    xbytes = jnp.dtype(x_ncl.dtype).itemsize
    n = x_ncl.shape[0]
    est = int(x_ncl.size) * xbytes                                  # resident input
    est += sum(int(p.size) * p.dtype.itemsize for p in flat)        # resident params
    l_cur = x_ncl.shape[2]
    for m in layer_meta:
        l_cur -= m["ksize"] - 1
        # K shifted operand slices + f32 accumulator + carried activation, per sample.
        est += n * l_cur * (m["ksize"] * m["c_in"] * cbytes + m["c_out"] * (4 + cbytes))
    est += n * layer_meta[-1]["c_out"] * l_cur * xbytes             # NCL output
    # 2x margin for vreg-tile padding / temporaries; stay within every generation's budget
    # (v5e default scoped limit is 16 MiB; v7x physical VMEM is 64 MiB).
    return int(min(48 * 2**20, max(16 * 2**20, 2 * est)))


def conv1d_block_forward(x_ncl, prepped):
    """Fused Conv1DBlock forward.  x_ncl: (N, C0, L) PyTorch NCL layout.  Returns NCL."""
    meta = prepped["layer_meta"]
    flat = prepped["flat"]
    N, _, L = x_ncl.shape
    L_out = L - sum(m["ksize"] - 1 for m in meta)
    c_out = prepped["c_out"]

    kernel = _make_fused_kernel(meta, N, prepped["compute_dtype"])

    # Single invocation, whole problem resident in VMEM: no grid, no pipelining, no
    # double-buffered blocks, and no pre/post-kernel layout passes in the wrapper.
    return pl.pallas_call(
        kernel,
        out_shape=jax.ShapeDtypeStruct((N, c_out, L_out), x_ncl.dtype),
        compiler_params=pltpu.CompilerParams(
            vmem_limit_bytes=_vmem_limit_bytes(x_ncl, flat, meta,
                                               prepped["compute_dtype"])),
    )(x_ncl, *flat)


# ---------------------------------------------------------------------------
# Pure-JAX reference (mirrors PyTorch training-mode forward)
# ---------------------------------------------------------------------------
def reference_forward(x_ncl, params):
    x = jnp.transpose(x_ncl, (0, 2, 1)).astype(jnp.float32)   # (N, L, C)
    n_layers = len(params)
    for i, p in enumerate(params):
        w = jnp.transpose(p["weight"], (2, 1, 0)).astype(jnp.float32)  # (K,C_in,C_out)
        K = w.shape[0]
        L_out = x.shape[1] - K + 1
        y = sum(jnp.einsum("nlc,cd->nld", x[:, k:k + L_out, :], w[k]) for k in range(K))
        if i < n_layers - 1:
            mean = jnp.mean(y, axis=(0, 1), keepdims=True)
            var = jnp.mean((y - mean) ** 2, axis=(0, 1), keepdims=True)
            y = (y - mean) * jax.lax.rsqrt(var + BN_EPS)
            y = y * p["gamma"][None] + p["beta"][None]
            y = jnp.maximum(y, 0.0)
        else:
            y = y + p["bias"][None]
        x = y
    return jnp.transpose(x, (0, 2, 1))


# ---------------------------------------------------------------------------
# Deterministic parameter construction (shapes follow the PyTorch __init__)
# ---------------------------------------------------------------------------
def init_params(key, channels, ksize):
    params = []
    n_layers = len(channels) - 1
    for i in range(n_layers):
        c_in, c_out = channels[i], channels[i + 1]
        key, kw, kb = jax.random.split(key, 3)
        scale = 1.0 / jnp.sqrt(c_in * ksize)
        weight = scale * jax.random.normal(kw, (c_out, c_in, ksize), jnp.float32)
        p = {"weight": weight}
        if i < n_layers - 1:
            # BatchNorm1d default init: gamma=1, beta=0
            p["gamma"] = jnp.ones((1, c_out), jnp.float32)
            p["beta"] = jnp.zeros((1, c_out), jnp.float32)
        else:
            p["bias"] = scale * jax.random.normal(kb, (1, c_out), jnp.float32)
        params.append(p)
    return params


if __name__ == "__main__":
    channels = (4, 16, 32, 8)    # -> 2x Conv1d+BN+ReLU + 1 final Conv1d (with bias)
    ksize = 3
    N, L = 2, 16

    key = jax.random.PRNGKey(0)
    key, kx = jax.random.split(key)
    x = jax.random.normal(kx, (N, channels[0], L), jnp.float32)   # PyTorch NCL layout

    params = init_params(key, channels, ksize)
    ref = jax.block_until_ready(reference_forward(x, params))
    expected_shape = (N, channels[-1], L - (len(channels) - 1) * (ksize - 1))
    assert ref.shape == expected_shape, ref.shape

    # f32 MXU operands: tight match against the pure-JAX reference.
    prepped_f32 = preprocess_params(params, compute_dtype=jnp.float32)
    out_f32 = jax.block_until_ready(conv1d_block_forward(x, prepped_f32))
    assert out_f32.shape == expected_shape, out_f32.shape
    assert jnp.allclose(out_f32, ref, atol=1e-3, rtol=1e-3), \
        float(jnp.max(jnp.abs(out_f32 - ref)))

    # bf16 MXU operands / bf16 carried activations (f32 accumulation & BN math):
    # looser tolerance, same semantics.
    prepped_bf16 = preprocess_params(params, compute_dtype=jnp.bfloat16)
    out_bf16 = jax.block_until_ready(conv1d_block_forward(x, prepped_bf16))
    assert out_bf16.shape == expected_shape, out_bf16.shape
    assert jnp.allclose(out_bf16, ref, atol=1e-1, rtol=1e-1), \
        float(jnp.max(jnp.abs(out_bf16 - ref)))

    print("KERNEL_OK")
</pallas_src>

<mosaic_0001>
module attributes {stable_mosaic.version = 11 : i64} {
  func.func @kernel(%arg0: memref<2x4x16xf32, #tpu.memory_space<vmem>>, %arg1: memref<3x16x4xf32, #tpu.memory_space<vmem>>, %arg2: memref<16x1xf32, #tpu.memory_space<vmem>>, %arg3: memref<16x1xf32, #tpu.memory_space<vmem>>, %arg4: memref<3x32x16xf32, #tpu.memory_space<vmem>>, %arg5: memref<32x1xf32, #tpu.memory_space<vmem>>, %arg6: memref<32x1xf32, #tpu.memory_space<vmem>>, %arg7: memref<3x8x32xf32, #tpu.memory_space<vmem>>, %arg8: memref<8x1xf32, #tpu.memory_space<vmem>>, %arg9: memref<2x8x10xf32, #tpu.memory_space<vmem>>) attributes {dimension_semantics = [], scalar_prefetch = 0 : i64, scratch_operands = 0 : i64, tpu.core_type = #tpu.core_type<tc>} {
    %c0 = arith.constant 0 : index
    %c0_0 = arith.constant 0 : index
    %c0_1 = arith.constant 0 : index
    %0 = vector.load %arg0[%c0, %c0_0, %c0_1] : memref<2x4x16xf32, #tpu.memory_space<vmem>>, vector<1x4x16xf32>
    %1 = vector.shape_cast %0 : vector<1x4x16xf32> to vector<4x16xf32>
    %c1 = arith.constant 1 : index
    %c0_2 = arith.constant 0 : index
    %c0_3 = arith.constant 0 : index
    %2 = vector.load %arg0[%c1, %c0_2, %c0_3] : memref<2x4x16xf32, #tpu.memory_space<vmem>>, vector<1x4x16xf32>
    %3 = vector.shape_cast %2 : vector<1x4x16xf32> to vector<4x16xf32>
    %c0_4 = arith.constant 0 : index
    %c0_5 = arith.constant 0 : index
    %c0_6 = arith.constant 0 : index
    %4 = vector.load %arg1[%c0_4, %c0_5, %c0_6] : memref<3x16x4xf32, #tpu.memory_space<vmem>>, vector<1x16x4xf32>
    %5 = vector.shape_cast %4 : vector<1x16x4xf32> to vector<16x4xf32>
    %c1_7 = arith.constant 1 : index
    %c0_8 = arith.constant 0 : index
    %c0_9 = arith.constant 0 : index
    %6 = vector.load %arg1[%c1_7, %c0_8, %c0_9] : memref<3x16x4xf32, #tpu.memory_space<vmem>>, vector<1x16x4xf32>
    %7 = vector.shape_cast %6 : vector<1x16x4xf32> to vector<16x4xf32>
    %c2 = arith.constant 2 : index
    %c0_10 = arith.constant 0 : index
    %c0_11 = arith.constant 0 : index
    %8 = vector.load %arg1[%c2, %c0_10, %c0_11] : memref<3x16x4xf32, #tpu.memory_space<vmem>>, vector<1x16x4xf32>
    %9 = vector.shape_cast %8 : vector<1x16x4xf32> to vector<16x4xf32>
    %10 = vector.extract_strided_slice %1 {offsets = [0, 0], sizes = [4, 14], strides = [1, 1]} : vector<4x16xf32> to vector<4x14xf32>
    %cst = arith.constant dense<0.000000e+00> : vector<16x14xf32>
    %11 = tpu.matmul %5, %10, %cst {dimension_numbers = #tpu.dot_dimension_numbers<[1], [0], [0], [1], [0, 0, 1, 1], [], []>} : vector<16x4xf32>, vector<4x14xf32>, vector<16x14xf32> -> vector<16x14xf32>
    %12 = vector.extract_strided_slice %1 {offsets = [0, 1], sizes = [4, 14], strides = [1, 1]} : vector<4x16xf32> to vector<4x14xf32>
    %cst_12 = arith.constant dense<0.000000e+00> : vector<16x14xf32>
    %13 = tpu.matmul %7, %12, %cst_12 {dimension_numbers = #tpu.dot_dimension_numbers<[1], [0], [0], [1], [0, 0, 1, 1], [], []>} : vector<16x4xf32>, vector<4x14xf32>, vector<16x14xf32> -> vector<16x14xf32>
    %14 = arith.addf %11, %13 : vector<16x14xf32>
    %15 = vector.extract_strided_slice %1 {offsets = [0, 2], sizes = [4, 14], strides = [1, 1]} : vector<4x16xf32> to vector<4x14xf32>
    %cst_13 = arith.constant dense<0.000000e+00> : vector<16x14xf32>
    %16 = tpu.matmul %9, %15, %cst_13 {dimension_numbers = #tpu.dot_dimension_numbers<[1], [0], [0], [1], [0, 0, 1, 1], [], []>} : vector<16x4xf32>, vector<4x14xf32>, vector<16x14xf32> -> vector<16x14xf32>
    %17 = arith.addf %14, %16 : vector<16x14xf32>
    %18 = vector.extract_strided_slice %3 {offsets = [0, 0], sizes = [4, 14], strides = [1, 1]} : vector<4x16xf32> to vector<4x14xf32>
    %cst_14 = arith.constant dense<0.000000e+00> : vector<16x14xf32>
    %19 = tpu.matmul %5, %18, %cst_14 {dimension_numbers = #tpu.dot_dimension_numbers<[1], [0], [0], [1], [0, 0, 1, 1], [], []>} : vector<16x4xf32>, vector<4x14xf32>, vector<16x14xf32> -> vector<16x14xf32>
    %20 = vector.extract_strided_slice %3 {offsets = [0, 1], sizes = [4, 14], strides = [1, 1]} : vector<4x16xf32> to vector<4x14xf32>
    %cst_15 = arith.constant dense<0.000000e+00> : vector<16x14xf32>
    %21 = tpu.matmul %7, %20, %cst_15 {dimension_numbers = #tpu.dot_dimension_numbers<[1], [0], [0], [1], [0, 0, 1, 1], [], []>} : vector<16x4xf32>, vector<4x14xf32>, vector<16x14xf32> -> vector<16x14xf32>
    %22 = arith.addf %19, %21 : vector<16x14xf32>
    %23 = vector.extract_strided_slice %3 {offsets = [0, 2], sizes = [4, 14], strides = [1, 1]} : vector<4x16xf32> to vector<4x14xf32>
    %cst_16 = arith.constant dense<0.000000e+00> : vector<16x14xf32>
    %24 = tpu.matmul %9, %23, %cst_16 {dimension_numbers = #tpu.dot_dimension_numbers<[1], [0], [0], [1], [0, 0, 1, 1], [], []>} : vector<16x4xf32>, vector<4x14xf32>, vector<16x14xf32> -> vector<16x14xf32>
    %25 = arith.addf %22, %24 : vector<16x14xf32>
    %c0_17 = arith.constant 0 : index
    %c0_18 = arith.constant 0 : index
    %26 = vector.load %arg2[%c0_17, %c0_18] : memref<16x1xf32, #tpu.memory_space<vmem>>, vector<16x1xf32>
    %c0_19 = arith.constant 0 : index
    %c0_20 = arith.constant 0 : index
    %27 = vector.load %arg3[%c0_19, %c0_20] : memref<16x1xf32, #tpu.memory_space<vmem>>, vector<16x1xf32>
    %cst_21 = arith.constant dense<0.000000e+00> : vector<16xf32>
    %28 = vector.multi_reduction <add>, %17, %cst_21 [1] : vector<16x14xf32> to vector<16xf32>
    %29 = vector.shape_cast %28 : vector<16xf32> to vector<16x1xf32>
    %cst_22 = arith.constant 0.000000e+00 : f32
    %30 = vector.broadcast %cst_22 : f32 to vector<16x1xf32>
    %31 = arith.addf %30, %29 : vector<16x1xf32>
    %cst_23 = arith.constant dense<0.000000e+00> : vector<16xf32>
    %32 = vector.multi_reduction <add>, %25, %cst_23 [1] : vector<16x14xf32> to vector<16xf32>
    %33 = vector.shape_cast %32 : vector<16xf32> to vector<16x1xf32>
    %34 = arith.addf %31, %33 : vector<16x1xf32>
    %cst_24 = arith.constant 0.0357142873 : f32
    %35 = vector.broadcast %cst_24 : f32 to vector<16x1xf32>
    %36 = arith.mulf %34, %35 : vector<16x1xf32>
    %37 = vector.broadcast %36 : vector<16x1xf32> to vector<16x14xf32>
    %38 = arith.subf %17, %37 : vector<16x14xf32>
    %39 = vector.broadcast %36 : vector<16x1xf32> to vector<16x14xf32>
    %40 = arith.subf %25, %39 : vector<16x14xf32>
    %41 = arith.mulf %38, %38 : vector<16x14xf32>
    %cst_25 = arith.constant dense<0.000000e+00> : vector<16xf32>
    %42 = vector.multi_reduction <add>, %41, %cst_25 [1] : vector<16x14xf32> to vector<16xf32>
    %43 = vector.shape_cast %42 : vector<16xf32> to vector<16x1xf32>
    %cst_26 = arith.constant 0.000000e+00 : f32
    %44 = vector.broadcast %cst_26 : f32 to vector<16x1xf32>
    %45 = arith.addf %44, %43 : vector<16x1xf32>
    %46 = arith.mulf %40, %40 : vector<16x14xf32>
    %cst_27 = arith.constant dense<0.000000e+00> : vector<16xf32>
    %47 = vector.multi_reduction <add>, %46, %cst_27 [1] : vector<16x14xf32> to vector<16xf32>
    %48 = vector.shape_cast %47 : vector<16xf32> to vector<16x1xf32>
    %49 = arith.addf %45, %48 : vector<16x1xf32>
    %cst_28 = arith.constant 0.0357142873 : f32
    %50 = vector.broadcast %cst_28 : f32 to vector<16x1xf32>
    %51 = arith.mulf %49, %50 : vector<16x1xf32>
    %cst_29 = arith.constant 9.99999974E-6 : f32
    %52 = vector.broadcast %cst_29 : f32 to vector<16x1xf32>
    %53 = arith.addf %51, %52 : vector<16x1xf32>
    %54 = math.rsqrt %53 : vector<16x1xf32>
    %55 = arith.mulf %26, %54 : vector<16x1xf32>
    %56 = vector.broadcast %55 : vector<16x1xf32> to vector<16x14xf32>
    %57 = arith.mulf %38, %56 : vector<16x14xf32>
    %58 = vector.broadcast %27 : vector<16x1xf32> to vector<16x14xf32>
    %59 = arith.addf %57, %58 : vector<16x14xf32>
    %cst_30 = arith.constant 0.000000e+00 : f32
    %60 = vector.broadcast %cst_30 : f32 to vector<16x14xf32>
    %61 = arith.maximumf %59, %60 : vector<16x14xf32>
    %62 = vector.broadcast %55 : vector<16x1xf32> to vector<16x14xf32>
    %63 = arith.mulf %40, %62 : vector<16x14xf32>
    %64 = vector.broadcast %27 : vector<16x1xf32> to vector<16x14xf32>
    %65 = arith.addf %63, %64 : vector<16x14xf32>
    %cst_31 = arith.constant 0.000000e+00 : f32
    %66 = vector.broadcast %cst_31 : f32 to vector<16x14xf32>
    %67 = arith.maximumf %65, %66 : vector<16x14xf32>
    %c0_32 = arith.constant 0 : index
    %c0_33 = arith.constant 0 : index
    %c0_34 = arith.constant 0 : index
    %68 = vector.load %arg4[%c0_32, %c0_33, %c0_34] : memref<3x32x16xf32, #tpu.memory_space<vmem>>, vector<1x32x16xf32>
    %69 = vector.shape_cast %68 : vector<1x32x16xf32> to vector<32x16xf32>
    %c1_35 = arith.constant 1 : index
    %c0_36 = arith.constant 0 : index
    %c0_37 = arith.constant 0 : index
    %70 = vector.load %arg4[%c1_35, %c0_36, %c0_37] : memref<3x32x16xf32, #tpu.memory_space<vmem>>, vector<1x32x16xf32>
    %71 = vector.shape_cast %70 : vector<1x32x16xf32> to vector<32x16xf32>
    %c2_38 = arith.constant 2 : index
    %c0_39 = arith.constant 0 : index
    %c0_40 = arith.constant 0 : index
    %72 = vector.load %arg4[%c2_38, %c0_39, %c0_40] : memref<3x32x16xf32, #tpu.memory_space<vmem>>, vector<1x32x16xf32>
    %73 = vector.shape_cast %72 : vector<1x32x16xf32> to vector<32x16xf32>
    %74 = vector.extract_strided_slice %61 {offsets = [0, 0], sizes = [16, 12], strides = [1, 1]} : vector<16x14xf32> to vector<16x12xf32>
    %cst_41 = arith.constant dense<0.000000e+00> : vector<32x12xf32>
    %75 = tpu.matmul %69, %74, %cst_41 {dimension_numbers = #tpu.dot_dimension_numbers<[1], [0], [0], [1], [0, 0, 1, 1], [], []>} : vector<32x16xf32>, vector<16x12xf32>, vector<32x12xf32> -> vector<32x12xf32>
    %76 = vector.extract_strided_slice %61 {offsets = [0, 1], sizes = [16, 12], strides = [1, 1]} : vector<16x14xf32> to vector<16x12xf32>
    %cst_42 = arith.constant dense<0.000000e+00> : vector<32x12xf32>
    %77 = tpu.matmul %71, %76, %cst_42 {dimension_numbers = #tpu.dot_dimension_numbers<[1], [0], [0], [1], [0, 0, 1, 1], [], []>} : vector<32x16xf32>, vector<16x12xf32>, vector<32x12xf32> -> vector<32x12xf32>
    %78 = arith.addf %75, %77 : vector<32x12xf32>
    %79 = vector.extract_strided_slice %61 {offsets = [0, 2], sizes = [16, 12], strides = [1, 1]} : vector<16x14xf32> to vector<16x12xf32>
    %cst_43 = arith.constant dense<0.000000e+00> : vector<32x12xf32>
    %80 = tpu.matmul %73, %79, %cst_43 {dimension_numbers = #tpu.dot_dimension_numbers<[1], [0], [0], [1], [0, 0, 1, 1], [], []>} : vector<32x16xf32>, vector<16x12xf32>, vector<32x12xf32> -> vector<32x12xf32>
    %81 = arith.addf %78, %80 : vector<32x12xf32>
    %82 = vector.extract_strided_slice %67 {offsets = [0, 0], sizes = [16, 12], strides = [1, 1]} : vector<16x14xf32> to vector<16x12xf32>
    %cst_44 = arith.constant dense<0.000000e+00> : vector<32x12xf32>
    %83 = tpu.matmul %69, %82, %cst_44 {dimension_numbers = #tpu.dot_dimension_numbers<[1], [0], [0], [1], [0, 0, 1, 1], [], []>} : vector<32x16xf32>, vector<16x12xf32>, vector<32x12xf32> -> vector<32x12xf32>
    %84 = vector.extract_strided_slice %67 {offsets = [0, 1], sizes = [16, 12], strides = [1, 1]} : vector<16x14xf32> to vector<16x12xf32>
    %cst_45 = arith.constant dense<0.000000e+00> : vector<32x12xf32>
    %85 = tpu.matmul %71, %84, %cst_45 {dimension_numbers = #tpu.dot_dimension_numbers<[1], [0], [0], [1], [0, 0, 1, 1], [], []>} : vector<32x16xf32>, vector<16x12xf32>, vector<32x12xf32> -> vector<32x12xf32>
    %86 = arith.addf %83, %85 : vector<32x12xf32>
    %87 = vector.extract_strided_slice %67 {offsets = [0, 2], sizes = [16, 12], strides = [1, 1]} : vector<16x14xf32> to vector<16x12xf32>
    %cst_46 = arith.constant dense<0.000000e+00> : vector<32x12xf32>
    %88 = tpu.matmul %73, %87, %cst_46 {dimension_numbers = #tpu.dot_dimension_numbers<[1], [0], [0], [1], [0, 0, 1, 1], [], []>} : vector<32x16xf32>, vector<16x12xf32>, vector<32x12xf32> -> vector<32x12xf32>
    %89 = arith.addf %86, %88 : vector<32x12xf32>
    %c0_47 = arith.constant 0 : index
    %c0_48 = arith.constant 0 : index
    %90 = vector.load %arg5[%c0_47, %c0_48] : memref<32x1xf32, #tpu.memory_space<vmem>>, vector<32x1xf32>
    %c0_49 = arith.constant 0 : index
    %c0_50 = arith.constant 0 : index
    %91 = vector.load %arg6[%c0_49, %c0_50] : memref<32x1xf32, #tpu.memory_space<vmem>>, vector<32x1xf32>
    %cst_51 = arith.constant dense<0.000000e+00> : vector<32xf32>
    %92 = vector.multi_reduction <add>, %81, %cst_51 [1] : vector<32x12xf32> to vector<32xf32>
    %93 = vector.shape_cast %92 : vector<32xf32> to vector<32x1xf32>
    %cst_52 = arith.constant 0.000000e+00 : f32
    %94 = vector.broadcast %cst_52 : f32 to vector<32x1xf32>
    %95 = arith.addf %94, %93 : vector<32x1xf32>
    %cst_53 = arith.constant dense<0.000000e+00> : vector<32xf32>
    %96 = vector.multi_reduction <add>, %89, %cst_53 [1] : vector<32x12xf32> to vector<32xf32>
    %97 = vector.shape_cast %96 : vector<32xf32> to vector<32x1xf32>
    %98 = arith.addf %95, %97 : vector<32x1xf32>
    %cst_54 = arith.constant 0.0416666679 : f32
    %99 = vector.broadcast %cst_54 : f32 to vector<32x1xf32>
    %100 = arith.mulf %98, %99 : vector<32x1xf32>
    %101 = vector.broadcast %100 : vector<32x1xf32> to vector<32x12xf32>
    %102 = arith.subf %81, %101 : vector<32x12xf32>
    %103 = vector.broadcast %100 : vector<32x1xf32> to vector<32x12xf32>
    %104 = arith.subf %89, %103 : vector<32x12xf32>
    %105 = arith.mulf %102, %102 : vector<32x12xf32>
    %cst_55 = arith.constant dense<0.000000e+00> : vector<32xf32>
    %106 = vector.multi_reduction <add>, %105, %cst_55 [1] : vector<32x12xf32> to vector<32xf32>
    %107 = vector.shape_cast %106 : vector<32xf32> to vector<32x1xf32>
    %cst_56 = arith.constant 0.000000e+00 : f32
    %108 = vector.broadcast %cst_56 : f32 to vector<32x1xf32>
    %109 = arith.addf %108, %107 : vector<32x1xf32>
    %110 = arith.mulf %104, %104 : vector<32x12xf32>
    %cst_57 = arith.constant dense<0.000000e+00> : vector<32xf32>
    %111 = vector.multi_reduction <add>, %110, %cst_57 [1] : vector<32x12xf32> to vector<32xf32>
    %112 = vector.shape_cast %111 : vector<32xf32> to vector<32x1xf32>
    %113 = arith.addf %109, %112 : vector<32x1xf32>
    %cst_58 = arith.constant 0.0416666679 : f32
    %114 = vector.broadcast %cst_58 : f32 to vector<32x1xf32>
    %115 = arith.mulf %113, %114 : vector<32x1xf32>
    %cst_59 = arith.constant 9.99999974E-6 : f32
    %116 = vector.broadcast %cst_59 : f32 to vector<32x1xf32>
    %117 = arith.addf %115, %116 : vector<32x1xf32>
    %118 = math.rsqrt %117 : vector<32x1xf32>
    %119 = arith.mulf %90, %118 : vector<32x1xf32>
    %120 = vector.broadcast %119 : vector<32x1xf32> to vector<32x12xf32>
    %121 = arith.mulf %102, %120 : vector<32x12xf32>
    %122 = vector.broadcast %91 : vector<32x1xf32> to vector<32x12xf32>
    %123 = arith.addf %121, %122 : vector<32x12xf32>
    %cst_60 = arith.constant 0.000000e+00 : f32
    %124 = vector.broadcast %cst_60 : f32 to vector<32x12xf32>
    %125 = arith.maximumf %123, %124 : vector<32x12xf32>
    %126 = vector.broadcast %119 : vector<32x1xf32> to vector<32x12xf32>
    %127 = arith.mulf %104, %126 : vector<32x12xf32>
    %128 = vector.broadcast %91 : vector<32x1xf32> to vector<32x12xf32>
    %129 = arith.addf %127, %128 : vector<32x12xf32>
    %cst_61 = arith.constant 0.000000e+00 : f32
    %130 = vector.broadcast %cst_61 : f32 to vector<32x12xf32>
    %131 = arith.maximumf %129, %130 : vector<32x12xf32>
    %c0_62 = arith.constant 0 : index
    %c0_63 = arith.constant 0 : index
    %c0_64 = arith.constant 0 : index
    %132 = vector.load %arg7[%c0_62, %c0_63, %c0_64] : memref<3x8x32xf32, #tpu.memory_space<vmem>>, vector<1x8x32xf32>
    %133 = vector.shape_cast %132 : vector<1x8x32xf32> to vector<8x32xf32>
    %c1_65 = arith.constant 1 : index
    %c0_66 = arith.constant 0 : index
    %c0_67 = arith.constant 0 : index
    %134 = vector.load %arg7[%c1_65, %c0_66, %c0_67] : memref<3x8x32xf32, #tpu.memory_space<vmem>>, vector<1x8x32xf32>
    %135 = vector.shape_cast %134 : vector<1x8x32xf32> to vector<8x32xf32>
    %c2_68 = arith.constant 2 : index
    %c0_69 = arith.constant 0 : index
    %c0_70 = arith.constant 0 : index
    %136 = vector.load %arg7[%c2_68, %c0_69, %c0_70] : memref<3x8x32xf32, #tpu.memory_space<vmem>>, vector<1x8x32xf32>
    %137 = vector.shape_cast %136 : vector<1x8x32xf32> to vector<8x32xf32>
    %138 = vector.extract_strided_slice %125 {offsets = [0, 0], sizes = [32, 10], strides = [1, 1]} : vector<32x12xf32> to vector<32x10xf32>
    %cst_71 = arith.constant dense<0.000000e+00> : vector<8x10xf32>
    %139 = tpu.matmul %133, %138, %cst_71 {dimension_numbers = #tpu.dot_dimension_numbers<[1], [0], [0], [1], [0, 0, 1, 1], [], []>} : vector<8x32xf32>, vector<32x10xf32>, vector<8x10xf32> -> vector<8x10xf32>
    %140 = vector.extract_strided_slice %125 {offsets = [0, 1], sizes = [32, 10], strides = [1, 1]} : vector<32x12xf32> to vector<32x10xf32>
    %cst_72 = arith.constant dense<0.000000e+00> : vector<8x10xf32>
    %141 = tpu.matmul %135, %140, %cst_72 {dimension_numbers = #tpu.dot_dimension_numbers<[1], [0], [0], [1], [0, 0, 1, 1], [], []>} : vector<8x32xf32>, vector<32x10xf32>, vector<8x10xf32> -> vector<8x10xf32>
    %142 = arith.addf %139, %141 : vector<8x10xf32>
    %143 = vector.extract_strided_slice %125 {offsets = [0, 2], sizes = [32, 10], strides = [1, 1]} : vector<32x12xf32> to vector<32x10xf32>
    %cst_73 = arith.constant dense<0.000000e+00> : vector<8x10xf32>
    %144 = tpu.matmul %137, %143, %cst_73 {dimension_numbers = #tpu.dot_dimension_numbers<[1], [0], [0], [1], [0, 0, 1, 1], [], []>} : vector<8x32xf32>, vector<32x10xf32>, vector<8x10xf32> -> vector<8x10xf32>
    %145 = arith.addf %142, %144 : vector<8x10xf32>
    %146 = vector.extract_strided_slice %131 {offsets = [0, 0], sizes = [32, 10], strides = [1, 1]} : vector<32x12xf32> to vector<32x10xf32>
    %cst_74 = arith.constant dense<0.000000e+00> : vector<8x10xf32>
    %147 = tpu.matmul %133, %146, %cst_74 {dimension_numbers = #tpu.dot_dimension_numbers<[1], [0], [0], [1], [0, 0, 1, 1], [], []>} : vector<8x32xf32>, vector<32x10xf32>, vector<8x10xf32> -> vector<8x10xf32>
    %148 = vector.extract_strided_slice %131 {offsets = [0, 1], sizes = [32, 10], strides = [1, 1]} : vector<32x12xf32> to vector<32x10xf32>
    %cst_75 = arith.constant dense<0.000000e+00> : vector<8x10xf32>
    %149 = tpu.matmul %135, %148, %cst_75 {dimension_numbers = #tpu.dot_dimension_numbers<[1], [0], [0], [1], [0, 0, 1, 1], [], []>} : vector<8x32xf32>, vector<32x10xf32>, vector<8x10xf32> -> vector<8x10xf32>
    %150 = arith.addf %147, %149 : vector<8x10xf32>
    %151 = vector.extract_strided_slice %131 {offsets = [0, 2], sizes = [32, 10], strides = [1, 1]} : vector<32x12xf32> to vector<32x10xf32>
    %cst_76 = arith.constant dense<0.000000e+00> : vector<8x10xf32>
    %152 = tpu.matmul %137, %151, %cst_76 {dimension_numbers = #tpu.dot_dimension_numbers<[1], [0], [0], [1], [0, 0, 1, 1], [], []>} : vector<8x32xf32>, vector<32x10xf32>, vector<8x10xf32> -> vector<8x10xf32>
    %153 = arith.addf %150, %152 : vector<8x10xf32>
    %c0_77 = arith.constant 0 : index
    %c0_78 = arith.constant 0 : index
    %154 = vector.load %arg8[%c0_77, %c0_78] : memref<8x1xf32, #tpu.memory_space<vmem>>, vector<8x1xf32>
    %155 = vector.broadcast %154 : vector<8x1xf32> to vector<8x10xf32>
    %156 = arith.addf %145, %155 : vector<8x10xf32>
    %157 = vector.broadcast %154 : vector<8x1xf32> to vector<8x10xf32>
    %158 = arith.addf %153, %157 : vector<8x10xf32>
    %c0_79 = arith.constant 0 : index
    %c0_80 = arith.constant 0 : index
    %c0_81 = arith.constant 0 : index
    %159 = vector.load %arg9[%c0_79, %c0_80, %c0_81] : memref<2x8x10xf32, #tpu.memory_space<vmem>>, vector<1x8x10xf32>
    %160 = vector.shape_cast %159 : vector<1x8x10xf32> to vector<8x10xf32>
    %161 = vector.shape_cast %156 : vector<8x10xf32> to vector<1x8x10xf32>
    tpu.vector_store %arg9[%c0_79, %c0_80, %c0_81], %161 {strides = array<i32>} : memref<2x8x10xf32, #tpu.memory_space<vmem>>, vector<1x8x10xf32>,
    %c1_82 = arith.constant 1 : index
    %c0_83 = arith.constant 0 : index
    %c0_84 = arith.constant 0 : index
    %162 = vector.load %arg9[%c1_82, %c0_83, %c0_84] : memref<2x8x10xf32, #tpu.memory_space<vmem>>, vector<1x8x10xf32>
    %163 = vector.shape_cast %162 : vector<1x8x10xf32> to vector<8x10xf32>
    %164 = vector.shape_cast %158 : vector<8x10xf32> to vector<1x8x10xf32>
    tpu.vector_store %arg9[%c1_82, %c0_83, %c0_84], %164 {strides = array<i32>} : memref<2x8x10xf32, #tpu.memory_space<vmem>>, vector<1x8x10xf32>,
    return
  }
}

</mosaic_0001>

<bundles_post_ra>
// kernel: tpu_custom_call.1
= control target key start
LH: loop header
LB: loop body
LE: loop exit
PB: predicated region body
PF: predicated region fallthrough
CT: control target
= control target key end

     0   :  { %s2265_s13 = smov 127   ;;  %vm54_vm0 = vcmask 1043456   ;;  %vm47_vm1 = vcmask 31744   ;;  %s2635_s0 = inlined_call_operand.vmem [shape: f32[2,4,16], index: 0, kind: input, shape index: {}]   ;;  %s2636_s1 = inlined_call_operand.vmem [shape: f32[3,16,4], index: 1, kind: input, shape index: {}]   ;;  %s2637_s2 = inlined_call_operand.vmem [shape: f32[16,1], index: 2, kind: input, shape index: {}]   ;;  %s2638_s3 = inlined_call_operand.vmem [shape: f32[16,1], index: 3, kind: input, shape index: {}]   ;;  %s2639_s4 = inlined_call_operand.vmem [shape: f32[3,32,16], index: 4, kind: input, shape index: {}]   ;;  %s2640_s5 = inlined_call_operand.vmem [shape: f32[32,1], index: 5, kind: input, shape index: {}]   ;;  %s2641_s6 = inlined_call_operand.vmem [shape: f32[32,1], index: 6, kind: input, shape index: {}]   ;;  %s2642_s7 = inlined_call_operand.vmem [shape: f32[3,8,32], index: 7, kind: input, shape index: {}]   ;;  %s2643_s8 = inlined_call_operand.vmem [shape: f32[8,1], index: 8, kind: input, shape index: {}]   ;;  %s2644_s9 = inlined_call_operand.hbm [shape: f32[2,8,10], index: 9, kind: output, shape index: {}]  }
   0x1   :  { %v33_v0 = vld [vmem:[%s2635_s0] sm:$0xf]  ;;  %v1918_v1 = vld [vmem:[%s2635_s0 + $0x4] sm:$0xf]  ;;  %v1919_v2 = vld [vmem:[%s2636_s1 + $0x10] sm:$0xff] }
   0x2   :  { %45 = vrot.lane.b32.xlu0 %v33_v0, %s2265_s13  ;;  %303 = vrot.lane.b32.xlu1 %v1918_v1, %s2265_s13  ;;  %v36_v3 = vld [vmem:[%s2636_s1] sm:$0xff]  ;;  %v37_v4 = vld [vmem:[%s2636_s1 + $0x8] sm:$0xff] }
   0x3   :  { %2070 = vmatprep.subr.msk.mxu1 %vm54_vm0, %v33_v0  ;;  %2067 = vmatprep.mubr.msk.f32.mxu0 %vm47_vm1, %v1919_v2 }
   0x4   :  { %2071 = vmatpush3.msk.msra.mxu1 %vm54_vm0, %v33_v0  ;;  %2072 = vmatprep.mubr.msk.f32.mxu1 %vm47_vm1, %v36_v3 }
   0x5   :  { %14 = vsyncpa [#allocation3], 0  ;;  %2073 = vmatmul.mubr.msk.f32.vlgmr.msra.gmra.mxu1 %vm47_vm1, %v37_v4  ;;  %s2266_s19 = smov 126   ;;  %v1920_v6 = vld [vmem:[%s2636_s1 + $0x18] sm:$0xff]  ;;  %v1921_v8 = vld [vmem:[%s2636_s1 + $0x20] sm:$0xff]  ;;  %vm544_vm2 = vcmask 113664  }
   0x6   :  { %215 = vrot.lane.b32.xlu0 %v33_v0, %s2266_s19  ;;  %459 = vrot.lane.b32.xlu1 %v1918_v1, %s2266_s19  ;;  %v1922_v10 = vld [vmem:[%s2636_s1 + $0x28] sm:$0xff]  ;;  %v2267_v56 = vmov 0   ;;  %vm649_vm3 = vcmask 130048   ;;  %vm1232_vm4 = vcmask 97280   ;;  %vm2269_vm5 = vmmov 0  }
   0x7   :  { %2082 = vmatprep.mubr.msk.f32.mxu1 %vm47_vm1, %v1919_v2  ;;  %2229 = vset.pattern.permute.xlu1 %v2267_v56  ;;  %vm1418_vm6 = vcmask 261120   ;;  %vm1898_vm7 = vcmask 80896  }
   0x8   :  { %2230 = vset.pattern.permute.xlu0 %v2267_v56 }
  0x74   :  { %v46_v5 = vpop.permute.xlu0 %45  ;;  %v304_v7 = vpop.permute.xlu1 %303 }
  0x75   :  { %2065 = vmatprep.subr.msk.mxu0 %vm54_vm0, %v46_v5  ;;  %2080 = vmatprep.subr.msk.mxu1 %vm54_vm0, %v304_v7 }
  0x76   :  { %2066 = vmatpush3.msk.msra.mxu0 %vm54_vm0, %v46_v5  ;;  %2081 = vmatpush3.msk.msra.mxu1 %vm54_vm0, %v304_v7 }
  0x77   :  { %2068 = vmatmul.mubr.msk.f32.vlgmr.msra.gmra.mxu0 %vm47_vm1, %v1920_v6  ;;  %2083 = vmatmul.mubr.msk.f32.vlgmr.msra.gmra.mxu1 %vm47_vm1, %v1920_v6  ;;  %v540_v6 = vld [vmem:[%s2637_s2] sm:$0xff] }
  0x78   :  { %v216_v9 = vpop.permute.xlu0 %215  ;;  %2077 = vmatprep.mubr.msk.f32.mxu0 %vm47_vm1, %v1921_v8  ;;  %v460_v11 = vpop.permute.xlu1 %459  ;;  %2092 = vmatprep.mubr.msk.f32.mxu1 %vm47_vm1, %v1921_v8  ;;  %v543_v8 = vld [vmem:[%s2638_s3 + $0x8] sm:$0xff] }
  0x79   :  { %2075 = vmatprep.subr.msk.mxu0 %vm54_vm0, %v216_v9  ;;  %2090 = vmatprep.subr.msk.mxu1 %vm54_vm0, %v460_v11 }
  0x7a   :  { %2076 = vmatpush3.msk.msra.mxu0 %vm54_vm0, %v216_v9  ;;  %2091 = vmatpush3.msk.msra.mxu1 %vm54_vm0, %v460_v11 }
  0x7b   :  { %2078 = vmatmul.mubr.msk.f32.vlgmr.msra.gmra.mxu0 %vm47_vm1, %v1922_v10  ;;  %2085 = vmatprep.subr.msk.mxu0 %vm54_vm0, %v1918_v1 }
  0x7c   :  { %2086 = vmatpush3.msk.msra.mxu0 %vm54_vm0, %v1918_v1  ;;  %2087 = vmatprep.mubr.msk.f32.mxu0 %vm47_vm1, %v36_v3  ;;  %v541_v3 = vld [vmem:[%s2637_s2 + $0x8] sm:$0xff] }
  0x7d   :  { %2093 = vmatmul.mubr.msk.f32.vlgmr.msra.gmra.mxu1 %vm47_vm1, %v1922_v10  ;;  %v542_v10 = vld [vmem:[%s2638_s3] sm:$0xff] }
  0x7f   :  { %2088 = vmatmul.mubr.msk.f32.vlgmr.msra.gmra.mxu0 %vm47_vm1, %v37_v4 }
  0xc5   :  { %v2074_v12 = vpop.f32.mrf.mxu1 }
  0xc7   :  { %v206_v13 = vpop.f32.mrf.mxu1 }
 0x137   :  { %v2069_v14 = vpop.f32.mrf.mxu0  ;;  %v2084_v15 = vpop.f32.mrf.mxu1 }
 0x138   :  { %v212_v17 = vadd.f32 %v2074_v12, %v2069_v14 }
 0x139   :  { %v123_v16 = vpop.f32.mrf.mxu0  ;;  %v373_v19 = vpop.f32.mrf.mxu1 }
 0x13a   :  { %v207_v20 = vadd.f32 %v206_v13, %v123_v16 }
 0x13b   :  { %v2079_v18 = vpop.f32.mrf.mxu0 }
 0x13c   :  { %v301_v21 = vadd.f32 %v2079_v18, %v212_v17  ;;  %v1941_v18 = vld [vmem:[%s2639_s4 + $0x20] sm:$0xff] }
 0x13d   :  { %v291_v22 = vpop.f32.mrf.mxu0  ;;  %v2094_v26 = vpop.f32.mrf.mxu1  ;;  %2099 = vmatprep.mubr.msk.f32.mxu0 %vm649_vm3, %v1941_v18 }
 0x13e   :  { %v300_v23 = vadd.f32 %v291_v22, %v207_v20  ;;  %v548_v24 = vsel %vm544_vm2, %v301_v21, 0.0 }
 0x13f   :  { %v2089_v25 = vpop.f32.mrf.mxu0  ;;  %549 = vadd.xlane.f32.xlu0 %v548_v24  ;;  %v529_v32 = vpop.f32.mrf.mxu1 }
 0x140   :  { %v456_v27 = vadd.f32 %v2089_v25, %v2084_v15  ;;  %v545_v31 = vsel %vm544_vm2, %v300_v23, 0.0 }
 0x141   :  { %v450_v28 = vpop.f32.mrf.mxu0 }
 0x142   :  { %v539_v29 = vadd.f32 %v2094_v26, %v456_v27  ;;  %v451_v30 = vadd.f32 %v450_v28, %v373_v19  ;;  %v2405_v19 = vld [vmem:[%s2639_s4] sm:$0xff]  ;;  %v2415_v26 = vld [vmem:[%s2639_s4 + $0x8] sm:$0xff]  ;;  %v629_v27 = vld [vmem:[%s2639_s4 + $0x10] sm:$0xff] }
 0x143   :  { %546 = vadd.xlane.f32.xlu0 %v545_v31  ;;  %2109 = vmatprep.mubr.msk.f32.mxu1 %vm649_vm3, %v2405_v19  ;;  %v630_v28 = vld [vmem:[%s2639_s4 + $0x18] sm:$0xff] }
 0x144   :  { %v538_v33 = vadd.f32 %v529_v32, %v451_v30  ;;  %v556_v34 = vsel %vm544_vm2, %v539_v29, 0.0 }
 0x145   :  { %557 = vadd.xlane.f32.xlu1 %v556_v34 }
 0x146   :  { %v553_v35 = vsel %vm544_vm2, %v538_v33, 0.0 }
 0x147   :  { %554 = vadd.xlane.f32.xlu0 %v553_v35  ;;  %v1942_v35 = vld [vmem:[%s2639_s4 + $0x28] sm:$0xff] }
 0x1c8   :  { %v550_v36 = vpop.xlane.xlu0 %549 }
 0x1cc   :  { %v547_v37 = vpop.xlane.xlu0 %546 }
 0x1ce   :  { %v558_v38 = vpop.xlane.xlu1 %557 }
 0x1cf   :  { %v560_v39 = vadd.f32 %v558_v38, %v550_v36  ;;  %v1943_v36 = vld [vmem:[%s2639_s4 + $0x30] sm:$0xff]  ;;  %v1944_v38 = vld [vmem:[%s2639_s4 + $0x38] sm:$0xff] }
 0x1d0   :  { %v555_v40 = vpop.xlane.xlu0 %554 }
 0x1d1   :  { %v562_v41 = vmul.f32 0.035714287, %v560_v39  ;;  %v559_v42 = vadd.f32 %v555_v40, %v547_v37  ;;  %v1945_v39 = vld [vmem:[%s2639_s4 + $0x40] sm:$0xff] }
 0x1d3   :  { %v564_v43 = vsub.f32 %v301_v21, %v562_v41  ;;  %v566_v44 = vsub.f32 %v539_v29, %v562_v41  ;;  %v561_v45 = vmul.f32 0.035714287, %v559_v42  ;;  %v1946_v41 = vld [vmem:[%s2639_s4 + $0x48] sm:$0xff]  ;;  %v1947_v42 = vld [vmem:[%s2639_s4 + $0x50] sm:$0xff] }
 0x1d5   :  { %v563_v46 = vsub.f32 %v300_v23, %v561_v45  ;;  %v2379_v47 = vsub.f32 %v538_v33, %v561_v45  ;;  %v568_v48 = vmul.f32 %v564_v43, %v564_v43  ;;  %v578_v49 = vmul.f32 %v566_v44, %v566_v44 }
 0x1d7   :  { %v572_v50 = vsel %vm544_vm2, %v568_v48, 0.0  ;;  %v582_v51 = vsel %vm544_vm2, %v578_v49, 0.0  ;;  %v577_v52 = vmul.f32 %v2379_v47, %v2379_v47  ;;  %v567_v53 = vmul.f32 %v563_v46, %v563_v46 }
 0x1d8   :  { %573 = vadd.xlane.f32.xlu1 %v572_v50  ;;  %583 = vadd.xlane.f32.xlu0 %v582_v51 }
 0x1d9   :  { %v579_v54 = vsel %vm544_vm2, %v577_v52, 0.0  ;;  %v569_v55 = vsel %vm544_vm2, %v567_v53, 0.0 }
 0x1dc   :  { %580 = vadd.xlane.f32.xlu0 %v579_v54  ;;  %570 = vadd.xlane.f32.xlu1 %v569_v55 }
 0x261   :  { %v574_v57 = vpop.xlane.xlu1 %573  ;;  %v584_v58 = vpop.xlane.xlu0 %583 }
 0x262   :  { %v586_v59 = vadd.f32 %v584_v58, %v574_v57 }
 0x264   :  { %v588_v60 = vmul.f32 0.035714287, %v586_v59 }
 0x265   :  { %v571_v61 = vpop.xlane.xlu1 %570  ;;  %v581_v62 = vpop.xlane.xlu0 %580 }
 0x266   :  { %v590_v63 = vadd.f32 1e-05, %v588_v60  ;;  %v585_v0 = vadd.f32 %v581_v62, %v571_v61 }
 0x268   :  { %2231 = vrsqrt.f32 %v590_v63  ;;  %v587_v1 = vmul.f32 0.035714287, %v585_v0 }
 0x26a   :  { %v589_v2 = vadd.f32 1e-05, %v587_v1 }
 0x26c   :  { %2233 = vrsqrt.f32 %v589_v2 }
 0x275   :  { %v2232_v4 = vpop.eup %2231 }
 0x276   :  { %v594_v5 = vmul.f32 %v2232_v4, %v541_v3 }
 0x278   :  { %602 = vperm.xlu1 %2229, %v594_v5  }
 0x279   :  { %v2234_v7 = vpop.eup %2233 }
 0x27a   :  { %v593_v9 = vmul.f32 %v2234_v7, %v540_v6 }
 0x27c   :  { %614 = vperm.xlu1 %2229, %v543_v8   ;;  %597 = vperm.xlu0 %2230, %v593_v9  }
 0x280   :  { %609 = vperm.xlu1 %2229, %v542_v10  }
 0x2f3   :  { %v603_v11 = vpop.permute.xlu1 %602 }
 0x2f4   :  { %v606_v12 = vmul.f32 %v603_v11, %v564_v43  ;;  %v622_v13 = vmul.f32 %v603_v11, %v566_v44  ;;  %v1948_v44 = vld [vmem:[%s2639_s4 + $0x58] sm:$0xff] }
 0x2f7   :  { %v615_v14 = vpop.permute.xlu1 %614  ;;  %v598_v15 = vpop.permute.xlu0 %597 }
 0x2f8   :  { %v618_v16 = vadd.f32 %v615_v14, %v606_v12  ;;  %v624_v17 = vadd.f32 %v622_v13, %v615_v14  ;;  %v605_v22 = vmul.f32 %v598_v15, %v563_v46  ;;  %v621_v29 = vmul.f32 %v598_v15, %v2379_v47 }
 0x2fa   :  { %v620_v20 = vmax.f32 %v618_v16, 0.0  ;;  %v626_v21 = vmax.f32 %v624_v17, 0.0 }
 0x2fb   :  { %v610_v23 = vpop.permute.xlu1 %609 }
 0x2fc   :  { %v617_v24 = vadd.f32 %v610_v23, %v605_v22  ;;  %645 = vrot.lane.b32.xlu1 %v620_v20, %s2265_s13  ;;  %2105 = vmatprep.subr.mxu1 %v620_v20  ;;  %v623_v30 = vadd.f32 %v621_v29, %v610_v23 }
 0x2fd   :  { %1131 = vrot.lane.b32.xlu0 %v626_v21, %s2266_s19  ;;  %2106 = vmatpush3.msra.mxu1 %v620_v20 }
 0x2fe   :  { %v619_v25 = vmax.f32 %v617_v24, 0.0  ;;  %v625_v31 = vmax.f32 %v623_v30, 0.0 }
 0x300   :  { %846 = vrot.lane.b32.xlu1 %v620_v20, %s2266_s19  ;;  %2107 = vmatprep.subr.mxu1 %v619_v25 }
 0x301   :  { %2108 = vmatpush3.msra.mxu1 %v619_v25 }
 0x302   :  { %2110 = vmatmul.mubr.msk.f32.vlgmr.msra.gmra.mxu1 %vm649_vm3, %v2415_v26 }
 0x303   :  { %2112 = vmatprep.mubr.msk.f32.mxu1 %vm649_vm3, %v629_v27 }
 0x304   :  { %643 = vrot.lane.b32.xlu1 %v619_v25, %s2265_s13 }
 0x306   :  { %2113 = vmatmul.mubr.msk.f32.gmra.mxu1 %vm649_vm3, %v630_v28 }
 0x307   :  { %2129 = vmatprep.mubr.msk.f32.mxu1 %vm649_vm3, %v1941_v18 }
 0x308   :  { %955 = vrot.lane.b32.xlu1 %v626_v21, %s2265_s13 }
 0x30c   :  { %844 = vrot.lane.b32.xlu1 %v619_v25, %s2266_s19 }
 0x310   :  { %953 = vrot.lane.b32.xlu1 %v625_v31, %s2265_s13 }
 0x314   :  { %1129 = vrot.lane.b32.xlu1 %v625_v31, %s2266_s19 }
 0x36e   :  { %v646_v32 = vpop.permute.xlu1 %645 }
 0x36f   :  { %2095 = vmatprep.subr.mxu0 %v646_v32  ;;  %v1132_v45 = vpop.permute.xlu0 %1131 }
 0x370   :  { %2096 = vmatpush3.msra.mxu0 %v646_v32 }
 0x372   :  { %v847_v33 = vpop.permute.xlu1 %846 }
 0x376   :  { %v644_v34 = vpop.permute.xlu1 %643 }
 0x377   :  { %2097 = vmatprep.subr.mxu0 %v644_v34 }
 0x378   :  { %2098 = vmatpush3.msra.mxu0 %v644_v34 }
 0x379   :  { %2100 = vmatmul.mubr.msk.f32.vlgmr.msra.gmra.mxu0 %vm649_vm3, %v1942_v35  ;;  %2115 = vmatprep.subr.mxu0 %v847_v33 }
 0x37a   :  { %2116 = vmatpush3.msra.mxu0 %v847_v33  ;;  %v956_v37 = vpop.permute.xlu1 %955  ;;  %2102 = vmatprep.mubr.msk.f32.mxu0 %vm649_vm3, %v1943_v36 }
 0x37b   :  { %2125 = vmatprep.subr.mxu1 %v956_v37 }
 0x37c   :  { %2126 = vmatpush3.msra.mxu1 %v956_v37 }
 0x37d   :  { %2103 = vmatmul.mubr.msk.f32.gmra.mxu0 %vm649_vm3, %v1944_v38 }
 0x37e   :  { %v845_v40 = vpop.permute.xlu1 %844  ;;  %2119 = vmatprep.mubr.msk.f32.mxu0 %vm649_vm3, %v1945_v39 }
 0x37f   :  { %2117 = vmatprep.subr.mxu0 %v845_v40 }
 0x380   :  { %2118 = vmatpush3.msra.mxu0 %v845_v40 }
 0x381   :  { %2120 = vmatmul.mubr.msk.f32.vlgmr.msra.gmra.mxu0 %vm649_vm3, %v1946_v41  ;;  %2135 = vmatprep.subr.mxu0 %v626_v21 }
 0x382   :  { %2136 = vmatpush3.msra.mxu0 %v626_v21  ;;  %v954_v43 = vpop.permute.xlu1 %953  ;;  %2122 = vmatprep.mubr.msk.f32.mxu0 %vm649_vm3, %v1947_v42 }
 0x383   :  { %2127 = vmatprep.subr.mxu1 %v954_v43  ;;  %2137 = vmatprep.subr.mxu0 %v625_v31 }
 0x384   :  { %2128 = vmatpush3.msra.mxu1 %v954_v43  ;;  %2138 = vmatpush3.msra.mxu0 %v625_v31 }
 0x385   :  { %2123 = vmatmul.mubr.msk.f32.gmra.mxu0 %vm649_vm3, %v1948_v44  ;;  %2130 = vmatmul.mubr.msk.f32.vlgmr.msra.gmra.mxu1 %vm649_vm3, %v1942_v35 }
 0x386   :  { %2145 = vmatprep.subr.mxu1 %v1132_v45  ;;  %v1130_v46 = vpop.permute.xlu1 %1129  ;;  %2132 = vmatprep.mubr.msk.f32.mxu1 %vm649_vm3, %v1943_v36 }
 0x387   :  { %2146 = vmatpush3.msra.mxu1 %v1132_v45  ;;  %2139 = vmatprep.mubr.msk.f32.mxu0 %vm649_vm3, %v2405_v19 }
 0x388   :  { %2147 = vmatprep.subr.mxu1 %v1130_v46 }
 0x389   :  { %2148 = vmatpush3.msra.mxu1 %v1130_v46  ;;  %2140 = vmatmul.mubr.msk.f32.vlgmr.msra.gmra.mxu0 %vm649_vm3, %v2415_v26 }
 0x38a   :  { %2133 = vmatmul.mubr.msk.f32.gmra.mxu1 %vm649_vm3, %v1944_v38  ;;  %2142 = vmatprep.mubr.msk.f32.mxu0 %vm649_vm3, %v629_v27 }
 0x38b   :  { %2149 = vmatprep.mubr.msk.f32.mxu1 %vm649_vm3, %v1945_v39 }
 0x38d   :  { %2143 = vmatmul.mubr.msk.f32.gmra.mxu0 %vm649_vm3, %v630_v28 }
 0x38e   :  { %2150 = vmatmul.mubr.msk.f32.vlgmr.msra.gmra.mxu1 %vm649_vm3, %v1946_v41 }
 0x38f   :  { %2152 = vmatprep.mubr.msk.f32.mxu1 %vm649_vm3, %v1947_v42 }
 0x392   :  { %2153 = vmatmul.mubr.msk.f32.gmra.mxu1 %vm649_vm3, %v1948_v44 }
 0x3c2   :  { %v2111_v47 = vpop.f32.mrf.mxu1 }
 0x3c4   :  { %v825_v50 = vpop.f32.mrf.mxu1 }
 0x3c6   :  { %v2114_v53 = vpop.f32.mrf.mxu1 }
 0x3c8   :  { %v835_v55 = vpop.f32.mrf.mxu1 }
 0x439   :  { %v2101_v48 = vpop.f32.mrf.mxu0 }
 0x43a   :  { %v831_v16 = vadd.f32 %v2111_v47, %v2101_v48 }
 0x43b   :  { %v728_v49 = vpop.f32.mrf.mxu0 }
 0x43c   :  { %v826_v24 = vadd.f32 %v825_v50, %v728_v49 }
 0x43d   :  { %v2104_v51 = vpop.f32.mrf.mxu0 }
 0x43e   :  { %v841_v57 = vadd.f32 %v2114_v53, %v2104_v51 }
 0x43f   :  { %v738_v52 = vpop.f32.mrf.mxu0 }
 0x440   :  { %v836_v60 = vadd.f32 %v835_v55, %v738_v52 }
 0x441   :  { %v2121_v54 = vpop.f32.mrf.mxu0 }
 0x442   :  { %v948_v20 = vadd.f32 %v2121_v54, %v831_v16 }
 0x443   :  { %v928_v56 = vpop.f32.mrf.mxu0 }
 0x444   :  { %v947_v27 = vadd.f32 %v928_v56, %v826_v24  ;;  %v1236_v28 = vsel %vm1232_vm4, %v948_v20, 0.0 }
 0x445   :  { %v2124_v58 = vpop.f32.mrf.mxu0  ;;  %v2131_v59 = vpop.f32.mrf.mxu1 }
 0x446   :  { %v950_v61 = vadd.f32 %v2124_v58, %v841_v57  ;;  %v1233_v30 = vsel %vm1232_vm4, %v947_v27, 0.0 }
 0x447   :  { %v938_v62 = vpop.f32.mrf.mxu0  ;;  %v1025_v63 = vpop.f32.mrf.mxu1 }
 0x448   :  { %v949_v0 = vadd.f32 %v938_v62, %v836_v60  ;;  %v1242_v1 = vsel %vm1232_vm4, %v950_v61, 0.0 }
 0x449   :  { %v2141_v2 = vpop.f32.mrf.mxu0  ;;  %1243 = vadd.xlane.f32.xlu0 %v1242_v1 }
 0x44a   :  { %v2134_v3 = vpop.f32.mrf.mxu1  ;;  %v1239_v6 = vsel %vm1232_vm4, %v949_v0, 0.0  ;;  %v1116_v7 = vadd.f32 %v2141_v2, %v2131_v59 }
 0x44b   :  { %v1110_v4 = vpop.f32.mrf.mxu0 }
 0x44c   :  { %v1035_v5 = vpop.f32.mrf.mxu1  ;;  %v1111_v21 = vadd.f32 %v1110_v4, %v1025_v63 }
 0x44d   :  { %v2144_v8 = vpop.f32.mrf.mxu0  ;;  %1240 = vadd.xlane.f32.xlu0 %v1239_v6 }
 0x44e   :  { %v2151_v9 = vpop.f32.mrf.mxu1  ;;  %v1126_v13 = vadd.f32 %v2144_v8, %v2134_v3  ;;  %v1230_v8 = vld [vmem:[%s2641_s6 + $0x10] sm:$0xff] }
 0x44f   :  { %v1221_v10 = vadd.f32 %v2151_v9, %v1116_v7  ;;  %v1120_v11 = vpop.f32.mrf.mxu0  ;;  %v1231_v7 = vld [vmem:[%s2641_s6 + $0x18] sm:$0xff] }
 0x450   :  { %v1201_v12 = vpop.f32.mrf.mxu1  ;;  %v1121_v17 = vadd.f32 %v1120_v11, %v1035_v5 }
 0x451   :  { %v1252_v14 = vsel %vm1232_vm4, %v1221_v10, 0.0  ;;  %v1220_v25 = vadd.f32 %v1201_v12, %v1111_v21 }
 0x452   :  { %1253 = vadd.xlane.f32.xlu0 %v1252_v14  ;;  %v2154_v15 = vpop.f32.mrf.mxu1 }
 0x453   :  { %v1223_v18 = vadd.f32 %v2154_v15, %v1126_v13  ;;  %v1249_v29 = vsel %vm1232_vm4, %v1220_v25, 0.0 }
 0x454   :  { %v1211_v19 = vpop.f32.mrf.mxu1 }
 0x455   :  { %v1222_v22 = vadd.f32 %v1211_v19, %v1121_v17  ;;  %v1258_v23 = vsel %vm1232_vm4, %v1223_v18, 0.0 }
 0x456   :  { %1259 = vadd.xlane.f32.xlu1 %v1258_v23 }
 0x457   :  { %v1255_v26 = vsel %vm1232_vm4, %v1222_v22, 0.0 }
 0x458   :  { %1256 = vadd.xlane.f32.xlu0 %v1255_v26 }
 0x45a   :  { %1237 = vadd.xlane.f32.xlu1 %v1236_v28 }
 0x45c   :  { %1250 = vadd.xlane.f32.xlu0 %v1249_v29  ;;  %v1225_v29 = vld [vmem:[%s2640_s5 + $0x8] sm:$0xff] }
 0x45e   :  { %1234 = vadd.xlane.f32.xlu1 %v1233_v30 }
 0x4d2   :  { %v1244_v31 = vpop.xlane.xlu0 %1243 }
 0x4d6   :  { %v1241_v32 = vpop.xlane.xlu0 %1240 }
 0x4db   :  { %v1254_v33 = vpop.xlane.xlu0 %1253 }
 0x4df   :  { %v1260_v34 = vpop.xlane.xlu1 %1259 }
 0x4e0   :  { %v1264_v35 = vadd.f32 %v1260_v34, %v1244_v31 }
 0x4e1   :  { %v1257_v36 = vpop.xlane.xlu0 %1256 }
 0x4e2   :  { %v1268_v37 = vmul.f32 0.041666668, %v1264_v35  ;;  %v1263_v38 = vadd.f32 %v1257_v36, %v1241_v32  ;;  %v1227_v32 = vld [vmem:[%s2640_s5 + $0x18] sm:$0xff]  ;;  %v1226_v35 = vld [vmem:[%s2640_s5 + $0x10] sm:$0xff] }
 0x4e3   :  { %v1238_v39 = vpop.xlane.xlu1 %1237 }
 0x4e4   :  { %v1262_v40 = vadd.f32 %v1254_v33, %v1238_v39  ;;  %v2484_v42 = vsub.f32 %v950_v61, %v1268_v37  ;;  %v2486_v43 = vsub.f32 %v1223_v18, %v1268_v37  ;;  %v1267_v44 = vmul.f32 0.041666668, %v1263_v38  ;;  %v1224_v39 = vld [vmem:[%s2640_s5] sm:$0xff] }
 0x4e5   :  { %v1251_v45 = vpop.xlane.xlu0 %1250  ;;  %v2268_v38 = vmov 0.0  }
 0x4e6   :  { %v1266_v41 = vmul.f32 0.041666668, %v1262_v40  ;;  %v2496_v52 = vsub.f32 %v949_v0, %v1267_v44  ;;  %v1300_v53 = vmul.f32 %v2486_v43, %v2486_v43  ;;  %v1280_v54 = vmul.f32 %v2484_v42, %v2484_v42  ;;  %2166 = vmatprep.subr.mxu1 %v2268_v38  ;;  %2155 = vmatprep.subr.mxu0 %v2268_v38 }
 0x4e7   :  { %v1235_v46 = vpop.xlane.xlu1 %1234  ;;  %v2502_v55 = vsub.f32 %v1222_v22, %v1267_v44  ;;  %2174 = vmatprep.mubr.msk.f32.mxu1 %vm2269_vm5, %v2268_v38  ;;  %2163 = vmatprep.mubr.msk.f32.mxu0 %vm2269_vm5, %v2268_v38 }
 0x4e8   :  { %v2488_v47 = vsub.f32 %v948_v20, %v1266_v41  ;;  %v2490_v48 = vsub.f32 %v1221_v10, %v1266_v41  ;;  %v1261_v49 = vadd.f32 %v1251_v45, %v1235_v46  ;;  %v1310_v59 = vsel %vm1232_vm4, %v1300_v53, 0.0  ;;  %v1229_v41 = vld [vmem:[%s2641_s6 + $0x8] sm:$0xff]  ;;  %v1228_v45 = vld [vmem:[%s2641_s6] sm:$0xff] }
 0x4e9   :  { %v1290_v60 = vsel %vm1232_vm4, %v1280_v54, 0.0  ;;  %v1299_v63 = vmul.f32 %v2502_v55, %v2502_v55  ;;  %v1279_v0 = vmul.f32 %v2496_v52, %v2496_v52 }
 0x4ea   :  { %v1298_v50 = vmul.f32 %v2490_v48, %v2490_v48  ;;  %v1278_v51 = vmul.f32 %v2488_v47, %v2488_v47  ;;  %v1265_v56 = vmul.f32 0.041666668, %v1261_v49 }
 0x4eb   :  { %v1307_v1 = vsel %vm1232_vm4, %v1299_v63, 0.0  ;;  %v1287_v2 = vsel %vm1232_vm4, %v1279_v0, 0.0 }
 0x4ec   :  { %v1304_v57 = vsel %vm1232_vm4, %v1298_v50, 0.0  ;;  %v1284_v58 = vsel %vm1232_vm4, %v1278_v51, 0.0  ;;  %v2508_v61 = vsub.f32 %v947_v27, %v1265_v56  ;;  %v2510_v62 = vsub.f32 %v1220_v25, %v1265_v56 }
 0x4ed   :  { %1305 = vadd.xlane.f32.xlu0 %v1304_v57  ;;  %1285 = vadd.xlane.f32.xlu1 %v1284_v58 }
 0x4ee   :  { %v1297_v3 = vmul.f32 %v2510_v62, %v2510_v62  ;;  %v1277_v4 = vmul.f32 %v2508_v61, %v2508_v61 }
 0x4f0   :  { %v1301_v5 = vsel %vm1232_vm4, %v1297_v3, 0.0  ;;  %v1281_v6 = vsel %vm1232_vm4, %v1277_v4, 0.0 }
 0x4f1   :  { %1311 = vadd.xlane.f32.xlu0 %v1310_v59  ;;  %1291 = vadd.xlane.f32.xlu1 %v1290_v60 }
 0x4f5   :  { %1308 = vadd.xlane.f32.xlu0 %v1307_v1  ;;  %1288 = vadd.xlane.f32.xlu1 %v1287_v2 }
 0x4f9   :  { %1302 = vadd.xlane.f32.xlu0 %v1301_v5  ;;  %1282 = vadd.xlane.f32.xlu1 %v1281_v6  ;;  %v2566_v5 = vld [vmem:[%s2642_s7] sm:$0xff] }
 0x50a   :  { %1374 = vperm.xlu1 %2229, %v1231_v7  }
 0x50f   :  { %1369 = vperm.xlu0 %2230, %v1230_v8  }
 0x576   :  { %v1286_v9 = vpop.xlane.xlu1 %1285  ;;  %v1306_v10 = vpop.xlane.xlu0 %1305 }
 0x577   :  { %v1314_v11 = vadd.f32 %v1306_v10, %v1286_v9 }
 0x579   :  { %v1318_v12 = vmul.f32 0.041666668, %v1314_v11 }
 0x57a   :  { %v1292_v13 = vpop.xlane.xlu1 %1291  ;;  %v1312_v14 = vpop.xlane.xlu0 %1311 }
 0x57b   :  { %v1322_v15 = vadd.f32 1e-05, %v1318_v12  ;;  %v1316_v16 = vadd.f32 %v1312_v14, %v1292_v13 }
 0x57d   :  { %2235 = vrsqrt.f32 %v1322_v15  ;;  %v1320_v17 = vmul.f32 0.041666668, %v1316_v16 }
 0x57e   :  { %v1289_v18 = vpop.xlane.xlu1 %1288  ;;  %v1309_v19 = vpop.xlane.xlu0 %1308 }
 0x57f   :  { %v1324_v20 = vadd.f32 1e-05, %v1320_v17  ;;  %v1315_v21 = vadd.f32 %v1309_v19, %v1289_v18  ;;  %v1973_v19 = vld [vmem:[%s2642_s7 + $0x8] sm:$0xff] }
 0x581   :  { %2237 = vrsqrt.f32 %v1324_v20  ;;  %v1319_v22 = vmul.f32 0.041666668, %v1315_v21 }
 0x582   :  { %v1283_v23 = vpop.xlane.xlu1 %1282  ;;  %v1303_v24 = vpop.xlane.xlu0 %1302 }
 0x583   :  { %v1323_v25 = vadd.f32 1e-05, %v1319_v22  ;;  %v1313_v26 = vadd.f32 %v1303_v24, %v1283_v23  ;;  %v1974_v24 = vld [vmem:[%s2642_s7 + $0x10] sm:$0xff]  ;;  %s2270_s7 = smov [#allocation2]  }
 0x584   :  { %s1907_s29 = sshll.u32 %s2270_s7, 4  ;;  %s1908_s29 = int_to_ptr.vmem [resolvable:$true] %s1907_s29 }
 0x585   :  { %2239 = vrsqrt.f32 %v1323_v25  ;;  %v1317_v27 = vmul.f32 0.041666668, %v1313_v26  ;;  %s2243_s30 = scalar_lea.vmem %s1908_s29, 256  ;;  %p2248_p1 = scmp.lt.s32.totalorder %s1908_s29, %s1908_s29 }
 0x586   :  { %v1375_v46 = vpop.permute.xlu1 %1374  ;;  %p2244_p0 = scmp.ne.s32.totalorder %s1908_s29, %s2243_s30  ;;  %p2249_p2 = scmp.lt.s32.totalorder %s2243_s30, %s2243_s30 }
 0x587   :  { %v1321_v28 = vadd.f32 1e-05, %v1317_v27 }
 0x588   :  { %p2250_p3 = por %p2249_p2, %p2248_p1 }
 0x589   :  { %2241 = vrsqrt.f32 %v1321_v28 }
 0x58a   :  { %v2236_v30 = vpop.eup %2235  ;;  %v1370_v50 = vpop.permute.xlu0 %1369  ;;  %p2251_p4 = pnand %p2250_p3, %p2244_p0 }
 0x58b   :  { %v1330_v31 = vmul.f32 %v2236_v30, %v1225_v29 }
 0x58d   :  { %1340 = vperm.xlu1 %2229, %v1330_v31  }
 0x58e   :  { %v2238_v33 = vpop.eup %2237 }
 0x58f   :  { %v1332_v34 = vmul.f32 %v2238_v33, %v1227_v32 }
 0x591   :  { %1350 = vperm.xlu1 %2229, %v1332_v34  }
 0x592   :  { %v2240_v36 = vpop.eup %2239 }
 0x593   :  { %v1331_v37 = vmul.f32 %v2240_v36, %v1226_v35 }
 0x595   :  { %1345 = vperm.xlu0 %2230, %v1331_v37  }
 0x596   :  { %v2242_v40 = vpop.eup %2241 }
 0x597   :  { %v1329_v44 = vmul.f32 %v2242_v40, %v1224_v39 }
 0x599   :  { %1364 = vperm.xlu0 %2230, %v1229_v41   ;;  %1335 = vperm.xlu1 %2229, %v1329_v44  }
 0x59d   :  { %1359 = vperm.xlu1 %2229, %v1228_v45  }
 0x608   :  { %v1341_v49 = vpop.permute.xlu1 %1340 }
 0x609   :  { %v1354_v59 = vmul.f32 %v1341_v49, %v2488_v47  ;;  %v1386_v9 = vmul.f32 %v1341_v49, %v2490_v48  ;;  %v1890_v48 = vld [vmem:[%s2643_s8] sm:$0xff] }
 0x60c   :  { %v1351_v51 = vpop.permute.xlu1 %1350 }
 0x60d   :  { %v1356_v53 = vmul.f32 %v1351_v51, %v2484_v42 }
 0x60f   :  { %v1380_v54 = vadd.f32 %v1375_v46, %v1356_v53 }
 0x610   :  { %v1346_v56 = vpop.permute.xlu0 %1345 }
 0x611   :  { %v1384_v57 = vmax.f32 %v1380_v54, 0.0  ;;  %v1355_v58 = vmul.f32 %v1346_v56, %v2496_v52  ;;  %v1388_v52 = vmul.f32 %v1351_v51, %v2486_v43  ;;  %v1387_v7 = vmul.f32 %v1346_v56, %v2502_v55 }
 0x613   :  { %v1379_v60 = vadd.f32 %v1370_v50, %v1355_v58  ;;  %2167 = vmatpush3.msra.mxu1 %v1384_v57  ;;  %v1392_v6 = vadd.f32 %v1388_v52, %v1375_v46  ;;  %v1391_v43 = vadd.f32 %v1387_v7, %v1370_v50 }
 0x614   :  { %v1336_v63 = vpop.permute.xlu1 %1335  ;;  %v1365_v0 = vpop.permute.xlu0 %1364  ;;  %2168 = vmatprep.subr.mxu1 %v2268_v38 }
 0x615   :  { %v1383_v1 = vmax.f32 %v1379_v60, 0.0  ;;  %v1378_v2 = vadd.f32 %v1365_v0, %v1354_v59  ;;  %v1353_v3 = vmul.f32 %v1336_v63, %v2508_v61  ;;  %v1396_v8 = vmax.f32 %v1392_v6, 0.0 }
 0x616   :  { %v1390_v55 = vadd.f32 %v1386_v9, %v1365_v0  ;;  %v1395_v10 = vmax.f32 %v1391_v43, 0.0  ;;  %v1385_v11 = vmul.f32 %v1336_v63, %v2510_v62 }
 0x617   :  { %v1382_v4 = vmax.f32 %v1378_v2, 0.0  ;;  %2169 = vmatpush3.msra.mxu1 %v1383_v1 }
 0x618   :  { %v1360_v42 = vpop.permute.xlu1 %1359  ;;  %2170 = vmatprep.subr.mxu1 %v2268_v38  ;;  %v1394_v12 = vmax.f32 %v1390_v55, 0.0 }
 0x619   :  { %v1377_v47 = vadd.f32 %v1360_v42, %v1353_v3  ;;  %1408 = vrot.lane.b32.xlu0 %v1382_v4, %s2265_s13  ;;  %2171 = vmatpush3.msra.mxu1 %v1382_v4  ;;  %v1389_v13 = vadd.f32 %v1385_v11, %v1360_v42 }
 0x61a   :  { %2172 = vmatprep.subr.mxu1 %v2268_v38 }
 0x61b   :  { %v1381_v61 = vmax.f32 %v1377_v47, 0.0  ;;  %v1393_v14 = vmax.f32 %v1389_v13, 0.0 }
 0x61d   :  { %1406 = vrot.lane.b32.xlu1 %v1381_v61, %s2265_s13  ;;  %1412 = vrot.lane.b32.xlu0 %v1384_v57, %s2265_s13 }
 0x61e   :  { %2173 = vmatpush3.msra.mxu1 %v1381_v61 }
 0x61f   :  { %2188 = vmatprep.subr.mxu1 %v2268_v38  ;;  %2175 = vmatmul.mubr.msk.f32.vlgmr.msra.gmra.mxu1 %vm1418_vm6, %v2566_v5 }
 0x620   :  { %2196 = vmatprep.mubr.msk.f32.mxu1 %vm2269_vm5, %v2268_v38 }
 0x621   :  { %1410 = vrot.lane.b32.xlu1 %v1383_v1, %s2265_s13  ;;  %1571 = vrot.lane.b32.xlu0 %v1384_v57, %s2266_s19 }
 0x625   :  { %1567 = vrot.lane.b32.xlu1 %v1382_v4, %s2266_s19  ;;  %1661 = vrot.lane.b32.xlu0 %v1396_v8, %s2265_s13 }
 0x629   :  { %1569 = vrot.lane.b32.xlu1 %v1383_v1, %s2266_s19  ;;  %1659 = vrot.lane.b32.xlu0 %v1395_v10, %s2265_s13 }
 0x62d   :  { %1565 = vrot.lane.b32.xlu1 %v1381_v61, %s2266_s19  ;;  %1657 = vrot.lane.b32.xlu0 %v1394_v12, %s2265_s13 }
 0x631   :  { %1655 = vrot.lane.b32.xlu1 %v1393_v14, %s2265_s13  ;;  %1813 = vrot.lane.b32.xlu0 %v1396_v8, %s2266_s19 }
 0x635   :  { %1811 = vrot.lane.b32.xlu1 %v1395_v10, %s2266_s19  ;;  %1809 = vrot.lane.b32.xlu0 %v1394_v12, %s2266_s19 }
 0x639   :  { %1807 = vrot.lane.b32.xlu1 %v1393_v14, %s2266_s19  ;;  %1893 = vperm.xlu0 %2230, %v1890_v48  }
 0x68b   :  { %v1409_v62 = vpop.permute.xlu0 %1408 }
 0x68f   :  { %v1407_v15 = vpop.permute.xlu1 %1406  ;;  %v1413_v16 = vpop.permute.xlu0 %1412 }
 0x690   :  { %2156 = vmatpush3.msra.mxu0 %v1413_v16 }
 0x691   :  { %2157 = vmatprep.subr.mxu0 %v2268_v38 }
 0x693   :  { %v1411_v17 = vpop.permute.xlu1 %1410  ;;  %v1572_v18 = vpop.permute.xlu0 %1571 }
 0x694   :  { %2158 = vmatpush3.msra.mxu0 %v1411_v17 }
 0x695   :  { %2159 = vmatprep.subr.mxu0 %v2268_v38 }
 0x696   :  { %2160 = vmatpush3.msra.mxu0 %v1409_v62 }
 0x697   :  { %v1568_v20 = vpop.permute.xlu1 %1567  ;;  %2161 = vmatprep.subr.mxu0 %v2268_v38  ;;  %v1662_v21 = vpop.permute.xlu0 %1661 }
 0x698   :  { %2162 = vmatpush3.msra.mxu0 %v1407_v15  ;;  %2189 = vmatpush3.msra.mxu1 %v1662_v21 }
 0x699   :  { %2177 = vmatprep.subr.mxu0 %v2268_v38  ;;  %2164 = vmatmul.mubr.msk.f32.vlgmr.msra.gmra.mxu0 %vm1418_vm6, %v1973_v19 }
 0x69a   :  { %2178 = vmatpush3.msra.mxu0 %v1572_v18  ;;  %2190 = vmatprep.subr.mxu1 %v2268_v38 }
 0x69b   :  { %v1570_v22 = vpop.permute.xlu1 %1569  ;;  %2179 = vmatprep.subr.mxu0 %v2268_v38  ;;  %v1660_v23 = vpop.permute.xlu0 %1659  ;;  %2185 = vmatprep.mubr.msk.f32.mxu0 %vm2269_vm5, %v2268_v38 }
 0x69c   :  { %2180 = vmatpush3.msra.mxu0 %v1570_v22  ;;  %2191 = vmatpush3.msra.mxu1 %v1660_v23 }
 0x69d   :  { %2181 = vmatprep.subr.mxu0 %v2268_v38  ;;  %2192 = vmatprep.subr.mxu1 %v2268_v38 }
 0x69e   :  { %2182 = vmatpush3.msra.mxu0 %v1568_v20 }
 0x69f   :  { %v1566_v25 = vpop.permute.xlu1 %1565  ;;  %2183 = vmatprep.subr.mxu0 %v2268_v38  ;;  %v1658_v26 = vpop.permute.xlu0 %1657 }
 0x6a0   :  { %2184 = vmatpush3.msra.mxu0 %v1566_v25  ;;  %2193 = vmatpush3.msra.mxu1 %v1658_v26 }
 0x6a1   :  { %2186 = vmatmul.mubr.msk.f32.vlgmr.msra.gmra.mxu0 %vm1418_vm6, %v1974_v24  ;;  %2199 = vmatprep.subr.mxu0 %v2268_v38 }
 0x6a2   :  { %2200 = vmatpush3.msra.mxu0 %v1396_v8  ;;  %2194 = vmatprep.subr.mxu1 %v2268_v38 }
 0x6a3   :  { %v1656_v27 = vpop.permute.xlu1 %1655  ;;  %2201 = vmatprep.subr.mxu0 %v2268_v38  ;;  %2207 = vmatprep.mubr.msk.f32.mxu0 %vm2269_vm5, %v2268_v38  ;;  %v1814_v28 = vpop.permute.xlu0 %1813 }
 0x6a4   :  { %2195 = vmatpush3.msra.mxu1 %v1656_v27  ;;  %2202 = vmatpush3.msra.mxu0 %v1395_v10 }
 0x6a5   :  { %2203 = vmatprep.subr.mxu0 %v2268_v38  ;;  %2210 = vmatprep.subr.mxu1 %v2268_v38 }
 0x6a6   :  { %2197 = vmatmul.mubr.msk.f32.vlgmr.msra.gmra.mxu1 %vm1418_vm6, %v1973_v19  ;;  %2204 = vmatpush3.msra.mxu0 %v1394_v12 }
 0x6a7   :  { %2211 = vmatpush3.msra.mxu1 %v1814_v28  ;;  %v1812_v29 = vpop.permute.xlu1 %1811  ;;  %2205 = vmatprep.subr.mxu0 %v2268_v38  ;;  %v1810_v30 = vpop.permute.xlu0 %1809 }
 0x6a8   :  { %2212 = vmatprep.subr.mxu1 %v2268_v38  ;;  %2206 = vmatpush3.msra.mxu0 %v1393_v14 }
 0x6a9   :  { %2213 = vmatpush3.msra.mxu1 %v1812_v29  ;;  %2208 = vmatmul.mubr.msk.f32.vlgmr.msra.gmra.mxu0 %vm1418_vm6, %v2566_v5 }
 0x6aa   :  { %2214 = vmatprep.subr.mxu1 %v2268_v38  ;;  %2218 = vmatprep.mubr.msk.f32.mxu1 %vm2269_vm5, %v2268_v38 }
 0x6ab   :  { %2215 = vmatpush3.msra.mxu1 %v1810_v30  ;;  %v1808_v31 = vpop.permute.xlu1 %1807 }
 0x6ac   :  { %2216 = vmatprep.subr.mxu1 %v2268_v38 }
 0x6ad   :  { %2217 = vmatpush3.msra.mxu1 %v1808_v31 }
 0x6ae   :  { %2219 = vmatmul.mubr.msk.f32.vlgmr.msra.gmra.mxu1 %vm1418_vm6, %v1974_v24 }
 0x6b4   :  { %v1894_v40 = vpop.permute.xlu0 %1893 }
 0x6df   :  { %v1561_v32 = vpop.f32.mrf.mxu1 }
 0x6e1   :  { %v2176_v33 = vpop.f32.mrf.mxu1 }
 0x759   :  { %v1488_v34 = vpop.f32.mrf.mxu0 }
 0x75a   :  { %v1562_v36 = vadd.f32 %v1561_v32, %v1488_v34 }
 0x75b   :  { %v2165_v35 = vpop.f32.mrf.mxu0 }
 0x761   :  { %v1646_v37 = vpop.f32.mrf.mxu0 }
 0x762   :  { %v1650_v39 = vadd.f32 %v1646_v37, %v1562_v36 }
 0x763   :  { %v2187_v41 = vpop.f32.mrf.mxu0 }
 0x764   :  { %v1896_v44 = vadd.f32 %v1894_v40, %v1650_v39 }
 0x766   :  { %1899 = vst.msk [vmem:[#allocation2] sm:$0xff] %vm1898_vm7, %v1896_v44  ;;  %v1733_v45 = vpop.f32.mrf.mxu1 }
 0x768   :  { %v2198_v46 = vpop.f32.mrf.mxu1 }
 0x769   :  { %v1803_v49 = vpop.f32.mrf.mxu0 }
 0x76a   :  { %v1804_v50 = vadd.f32 %v1803_v49, %v1733_v45 }
 0x76b   :  { %v2209_v38 = vpop.f32.mrf.mxu0 }
 0x76e   :  { %v1885_v51 = vpop.f32.mrf.mxu1 }
 0x76f   :  { %v1889_v53 = vadd.f32 %v1885_v51, %v1804_v50 }
 0x770   :  { %v2220_v54 = vpop.f32.mrf.mxu1 }
 0x771   :  { %v1897_v56 = vadd.f32 %v1894_v40, %v1889_v53 }
 0x773   :  { %1901 = vst.msk [vmem:[#allocation2 + $0x8] sm:$0xff] %vm1898_vm7, %v1897_v56 }
 0x774   :  { %2254 = shalt.err (!%p2251_p4)
}
 0x775   :  { %s2271_s10 = smov 128   ;;  %s2272_s11 = smov 8  }
 0x776   :  { %1913 = dma.vmem_to_hbm [thread:$0]  %s1908_s29, 256, %s2644_s9, [#allocation3], %s2271_s10, %s2271_s10, %s2272_s11  }
 0x777   :  { %2263 = dma.done.wait [#allocation3], 256  }
 0x778   :  { %2264 = vsyncadd [#allocation3], 4294967040 }
 0x779   :  { %1917 = vsyncpa [#allocation3], 1 }

</bundles_post_ra>
